<compile_context>
chip_gen: v6e
topology: v6e:2x2x1
jax: 0.10.0
libtpu: 0.0.40
codegen_flags: <defaults>
</compile_context>

<pallas_src>
import math

import jax
import jax.numpy as jnp
from jax import lax
from jax.experimental import pallas as pl
from jax.experimental.pallas import tpu as pltpu

EMB = 32
HEADS = 4
HEAD_DIM = EMB // HEADS
MLP_DIM = 64
SEQ = 8
BATCH = 2
LN_EPS = 1e-5


def encoder_layer_kernel(x_ref, wq_ref, wk_ref, wv_ref, wo_ref, w1_ref, w2_ref,
                         vec_ref, amask_ref, hmask_ref, o_ref):
    # x_ref: (T, E) with T = B*S tokens.  Single grid step over the whole slab.
    x = x_ref[...].astype(jnp.float32)                       # (T, E)
    T = x.shape[0]

    # packed per-row vectors (all at lane offset 0 -> cheap views)
    bq = vec_ref[0:1, 0:EMB]
    bk = vec_ref[1:2, 0:EMB]
    bv = vec_ref[2:3, 0:EMB]
    bo = vec_ref[3:4, 0:EMB]
    b1 = vec_ref[4:5, 0:MLP_DIM]
    b2 = vec_ref[5:6, 0:EMB]
    g1 = vec_ref[6:7, 0:EMB]
    be1 = vec_ref[7:8, 0:EMB]
    g2 = vec_ref[8:9, 0:EMB]
    be2 = vec_ref[9:10, 0:EMB]

    def layernorm(v, g, b):
        mu = jnp.mean(v, axis=-1, keepdims=True)
        var = jnp.mean((v - mu) ** 2, axis=-1, keepdims=True)
        return (v - mu) * lax.rsqrt(var + LN_EPS) * g + b

    # ---- Q/K/V projections: three clean full-width matmuls, no lane slicing ----
    q = jnp.dot(x, wq_ref[...], preferred_element_type=jnp.float32) + bq   # (T, E)
    k = jnp.dot(x, wk_ref[...], preferred_element_type=jnp.float32) + bk   # (T, E)
    v = jnp.dot(x, wv_ref[...], preferred_element_type=jnp.float32) + bv   # (T, E)

    # ---- heads stacked on sublanes: row (h*T + t) of the (H*T, E) slab holds
    # token t with only head-h columns kept (precomputed 0/1 mask, VALU mul).
    hmask = hmask_ref[...]                                     # (H*T, E)
    q_stack = jnp.concatenate([q] * HEADS, axis=0) * hmask     # (H*T, E)

    # ONE matmul for every head's scores: zeroed columns drop out of the
    # contraction, so row h*T+t against column s is exactly q_h(t) . k_h(s).
    s = lax.dot_general(q_stack, k, (((1,), (1,)), ((), ())),
                        preferred_element_type=jnp.float32)    # (H*T, T)
    s = s * (1.0 / math.sqrt(HEAD_DIM)) + amask_ref[...]       # batch block-diag mask

    # ONE stacked softmax (single lane max + single lane sum for all heads/batches)
    s = s - jnp.max(s, axis=-1, keepdims=True)
    e = jnp.exp(s)
    p = e * pl.reciprocal(jnp.sum(e, axis=-1, keepdims=True), approx=True)
    # TODO(synk): attention/residual dropout (p=0.1) omitted — identity at inference.

    # ONE matmul for P @ V (full width), then fold heads back with the same
    # 0/1 column mask + sublane-slice adds (no lane concatenation / extracts).
    o_stack = jnp.dot(p, v, preferred_element_type=jnp.float32) * hmask    # (H*T, E)
    o_comb = o_stack[0:T]
    for h in range(1, HEADS):
        o_comb = o_comb + o_stack[h * T:(h + 1) * T]            # (T, E)

    # ONE full-depth (T,E)@(E,E) output projection
    attn = jnp.dot(o_comb, wo_ref[...], preferred_element_type=jnp.float32) + bo

    # residual + LayerNorm1
    x1 = layernorm(x + attn, g1, be1)

    # ---- MLP: Linear -> GELU (exact erf) -> Linear ----
    h1 = jnp.dot(x1, w1_ref[...], preferred_element_type=jnp.float32) + b1
    h1 = 0.5 * h1 * (1.0 + lax.erf(h1 * (1.0 / math.sqrt(2.0))))
    h2 = jnp.dot(h1, w2_ref[...], preferred_element_type=jnp.float32) + b2

    # residual + LayerNorm2
    o_ref[...] = layernorm(x1 + h2, g2, be2).astype(o_ref.dtype)


def pack_params(params, batch, seq):
    """One-time host-side packing (hoisted out of the per-call path)."""
    T = batch * seq
    packed = dict(
        wq=params["wq"].T, wk=params["wk"].T, wv=params["wv"].T,
        wo=params["wo"].T, w1=params["w1"].T, w2=params["w2"].T,
    )

    def row(vv, width=MLP_DIM):
        vv = jnp.asarray(vv).reshape(1, -1)
        return jnp.pad(vv, ((0, 0), (0, width - vv.shape[1])))

    packed["vec"] = jnp.concatenate(
        [row(params["bq"]), row(params["bk"]), row(params["bv"]), row(params["bo"]),
         row(params["b1"]), row(params["b2"]), row(params["g1"]), row(params["be1"]),
         row(params["g2"]), row(params["be2"])], axis=0)                 # (10, 64)

    # additive batch block-diagonal mask, pre-stacked over heads: (H*T, T)
    r = jnp.arange(HEADS * T)
    rb = (r % T) // seq
    cb = jnp.arange(T) // seq
    packed["amask"] = jnp.where(rb[:, None] == cb[None, :], 0.0,
                                -1e30).astype(jnp.float32)               # (H*T, T)

    # per-head 0/1 column mask: row h*T+t keeps columns [h*D, (h+1)*D)
    hm = (r // T)[:, None] == (jnp.arange(EMB) // HEAD_DIM)[None, :]
    packed["hmask"] = hm.astype(jnp.float32)                             # (H*T, E)
    return packed


@jax.jit
def transformer_encoder_layer(x, packed):
    B, S, E = x.shape
    T = B * S
    xf = x.reshape(T, E)

    def spec(arr):
        return pl.BlockSpec(arr.shape, lambda i: (0, 0))

    inputs = (xf, packed["wq"], packed["wk"], packed["wv"], packed["wo"],
              packed["w1"], packed["w2"], packed["vec"], packed["amask"],
              packed["hmask"])

    out = pl.pallas_call(
        encoder_layer_kernel,
        out_shape=jax.ShapeDtypeStruct((T, E), x.dtype),
        grid_spec=pltpu.PrefetchScalarGridSpec(
            num_scalar_prefetch=0,
            grid=(1,),   # whole (16, 32) token slab in one step; for real token
                         # counts, tile tokens on a leading "parallel" grid axis.
            in_specs=[spec(a) for a in inputs],
            out_specs=pl.BlockSpec((T, E), lambda i: (0, 0)),
        ),
        compiler_params=pltpu.CompilerParams(
            dimension_semantics=("arbitrary",)),
    )(*inputs)
    return out.reshape(B, S, E)


def init_params(key):
    ks = jax.random.split(key, 16)

    def lin(kw, kb, out_dim, in_dim):
        bound = 1.0 / math.sqrt(in_dim)
        w = jax.random.uniform(kw, (out_dim, in_dim), jnp.float32, -bound, bound)
        b = jax.random.uniform(kb, (1, out_dim), jnp.float32, -bound, bound)
        return w, b

    wq, bq = lin(ks[0], ks[1], EMB, EMB)
    wk, bk = lin(ks[2], ks[3], EMB, EMB)
    wv, bv = lin(ks[4], ks[5], EMB, EMB)
    wo, bo = lin(ks[6], ks[7], EMB, EMB)
    w1, b1 = lin(ks[8], ks[9], MLP_DIM, EMB)
    w2, b2 = lin(ks[10], ks[11], EMB, MLP_DIM)
    return dict(
        wq=wq, bq=bq, wk=wk, bk=bk, wv=wv, bv=bv, wo=wo, bo=bo,
        g1=jnp.ones((1, EMB), jnp.float32), be1=jnp.zeros((1, EMB), jnp.float32),
        w1=w1, b1=b1, w2=w2, b2=b2,
        g2=jnp.ones((1, EMB), jnp.float32), be2=jnp.zeros((1, EMB), jnp.float32),
    )


def reference(x, p):
    """Pure-JAX reference mirroring the PyTorch forward (dropout = identity)."""
    def lin(v, w, b):
        return v @ w.T + b

    def ln(v, g, b):
        mu = jnp.mean(v, axis=-1, keepdims=True)
        var = jnp.mean((v - mu) ** 2, axis=-1, keepdims=True)
        return (v - mu) / jnp.sqrt(var + LN_EPS) * g + b

    bs, S, E = x.shape
    q = lin(x, p["wq"], p["bq"]).reshape(bs, S, HEADS, HEAD_DIM).transpose(0, 2, 1, 3)
    k = lin(x, p["wk"], p["bk"]).reshape(bs, S, HEADS, HEAD_DIM).transpose(0, 2, 1, 3)
    v = lin(x, p["wv"], p["bv"]).reshape(bs, S, HEADS, HEAD_DIM).transpose(0, 2, 1, 3)
    s = jnp.einsum("bhqd,bhkd->bhqk", q, k) / math.sqrt(HEAD_DIM)
    w = jax.nn.softmax(s, axis=-1)
    o = jnp.einsum("bhqk,bhkd->bhqd", w, v).transpose(0, 2, 1, 3).reshape(bs, S, E)
    o = lin(o, p["wo"], p["bo"])
    x = ln(x + o, p["g1"], p["be1"])
    h = lin(x, p["w1"], p["b1"])
    h = 0.5 * h * (1.0 + lax.erf(h / math.sqrt(2.0)))
    h = lin(h, p["w2"], p["b2"])
    return ln(x + h, p["g2"], p["be2"])


if __name__ == "__main__":
    key = jax.random.PRNGKey(0)
    kx, kp = jax.random.split(key)
    x = jax.random.normal(kx, (BATCH, SEQ, EMB), jnp.float32)
    params = init_params(kp)

    packed = pack_params(params, BATCH, SEQ)       # one-time packing, reused per call
    packed = jax.tree_util.tree_map(jax.block_until_ready, packed)

    out = transformer_encoder_layer(x, packed)
    out = jax.block_until_ready(out)

    ref = reference(x, params)
    assert out.shape == (BATCH, SEQ, EMB)
    # tolerance covers the ~2^-12 relative error of the EUP approximate
    # reciprocal used for the softmax denominator (perf-review item).
    assert jnp.allclose(out, ref, atol=2e-3, rtol=2e-3), "mismatch vs reference"
    print("KERNEL_OK")
</pallas_src>

<mosaic_0001>
module attributes {stable_mosaic.version = 11 : i64} {
  func.func @encoder_layer_kernel(%arg0: i32, %arg1: memref<16x32xf32, #tpu.memory_space<vmem>>, %arg2: memref<32x32xf32, #tpu.memory_space<vmem>>, %arg3: memref<32x32xf32, #tpu.memory_space<vmem>>, %arg4: memref<32x32xf32, #tpu.memory_space<vmem>>, %arg5: memref<32x32xf32, #tpu.memory_space<vmem>>, %arg6: memref<32x64xf32, #tpu.memory_space<vmem>>, %arg7: memref<64x32xf32, #tpu.memory_space<vmem>>, %arg8: memref<10x64xf32, #tpu.memory_space<vmem>>, %arg9: memref<64x16xf32, #tpu.memory_space<vmem>>, %arg10: memref<64x32xf32, #tpu.memory_space<vmem>>, %arg11: memref<16x32xf32, #tpu.memory_space<vmem>>) attributes {dimension_semantics = [#tpu.dimension_semantics<arbitrary>], iteration_bounds = array<i64: 1>, scalar_prefetch = 0 : i64, scratch_operands = 0 : i64, tpu.core_type = #tpu.core_type<tc>, window_params = [{pipeline_mode = #tpu.pipeline_mode<synchronous>, transform_indices = @transform_0, window_bounds = array<i64: 16, 32>}, {pipeline_mode = #tpu.pipeline_mode<synchronous>, transform_indices = @transform_1, window_bounds = array<i64: 32, 32>}, {pipeline_mode = #tpu.pipeline_mode<synchronous>, transform_indices = @transform_2, window_bounds = array<i64: 32, 32>}, {pipeline_mode = #tpu.pipeline_mode<synchronous>, transform_indices = @transform_3, window_bounds = array<i64: 32, 32>}, {pipeline_mode = #tpu.pipeline_mode<synchronous>, transform_indices = @transform_4, window_bounds = array<i64: 32, 32>}, {pipeline_mode = #tpu.pipeline_mode<synchronous>, transform_indices = @transform_5, window_bounds = array<i64: 32, 64>}, {pipeline_mode = #tpu.pipeline_mode<synchronous>, transform_indices = @transform_6, window_bounds = array<i64: 64, 32>}, {pipeline_mode = #tpu.pipeline_mode<synchronous>, transform_indices = @transform_7, window_bounds = array<i64: 10, 64>}, {pipeline_mode = #tpu.pipeline_mode<synchronous>, transform_indices = @transform_8, window_bounds = array<i64: 64, 16>}, {pipeline_mode = #tpu.pipeline_mode<synchronous>, transform_indices = @transform_9, window_bounds = array<i64: 64, 32>}, {pipeline_mode = #tpu.pipeline_mode<synchronous>, transform_indices = @transform_10, window_bounds = array<i64: 16, 32>}]} {
    %c0 = arith.constant 0 : index
    %c0_0 = arith.constant 0 : index
    %0 = vector.load %arg1[%c0, %c0_0] : memref<16x32xf32, #tpu.memory_space<vmem>>, vector<16x32xf32>
    %c0_1 = arith.constant 0 : index
    %c0_2 = arith.constant 0 : index
    %1 = vector.load %arg8[%c0_1, %c0_2] : memref<10x64xf32, #tpu.memory_space<vmem>>, vector<1x32xf32>
    %c1 = arith.constant 1 : index
    %c0_3 = arith.constant 0 : index
    %2 = vector.load %arg8[%c1, %c0_3] : memref<10x64xf32, #tpu.memory_space<vmem>>, vector<1x32xf32>
    %c2 = arith.constant 2 : index
    %c0_4 = arith.constant 0 : index
    %3 = vector.load %arg8[%c2, %c0_4] : memref<10x64xf32, #tpu.memory_space<vmem>>, vector<1x32xf32>
    %c3 = arith.constant 3 : index
    %c0_5 = arith.constant 0 : index
    %4 = vector.load %arg8[%c3, %c0_5] : memref<10x64xf32, #tpu.memory_space<vmem>>, vector<1x32xf32>
    %c4 = arith.constant 4 : index
    %c0_6 = arith.constant 0 : index
    %5 = vector.load %arg8[%c4, %c0_6] : memref<10x64xf32, #tpu.memory_space<vmem>>, vector<1x64xf32>
    %c5 = arith.constant 5 : index
    %c0_7 = arith.constant 0 : index
    %6 = vector.load %arg8[%c5, %c0_7] : memref<10x64xf32, #tpu.memory_space<vmem>>, vector<1x32xf32>
    %c6 = arith.constant 6 : index
    %c0_8 = arith.constant 0 : index
    %7 = vector.load %arg8[%c6, %c0_8] : memref<10x64xf32, #tpu.memory_space<vmem>>, vector<1x32xf32>
    %c7 = arith.constant 7 : index
    %c0_9 = arith.constant 0 : index
    %8 = vector.load %arg8[%c7, %c0_9] : memref<10x64xf32, #tpu.memory_space<vmem>>, vector<1x32xf32>
    %c8 = arith.constant 8 : index
    %c0_10 = arith.constant 0 : index
    %9 = vector.load %arg8[%c8, %c0_10] : memref<10x64xf32, #tpu.memory_space<vmem>>, vector<1x32xf32>
    %c9 = arith.constant 9 : index
    %c0_11 = arith.constant 0 : index
    %10 = vector.load %arg8[%c9, %c0_11] : memref<10x64xf32, #tpu.memory_space<vmem>>, vector<1x32xf32>
    %c0_12 = arith.constant 0 : index
    %c0_13 = arith.constant 0 : index
    %11 = vector.load %arg2[%c0_12, %c0_13] : memref<32x32xf32, #tpu.memory_space<vmem>>, vector<32x32xf32>
    %cst = arith.constant dense<0.000000e+00> : vector<16x32xf32>
    %12 = tpu.matmul %0, %11, %cst {dimension_numbers = #tpu.dot_dimension_numbers<[1], [0], [0], [1], [0, 0, 1, 1], [], []>} : vector<16x32xf32>, vector<32x32xf32>, vector<16x32xf32> -> vector<16x32xf32>
    %13 = vector.broadcast %1 : vector<1x32xf32> to vector<16x32xf32>
    %14 = arith.addf %12, %13 : vector<16x32xf32>
    %c0_14 = arith.constant 0 : index
    %c0_15 = arith.constant 0 : index
    %15 = vector.load %arg3[%c0_14, %c0_15] : memref<32x32xf32, #tpu.memory_space<vmem>>, vector<32x32xf32>
    %cst_16 = arith.constant dense<0.000000e+00> : vector<16x32xf32>
    %16 = tpu.matmul %0, %15, %cst_16 {dimension_numbers = #tpu.dot_dimension_numbers<[1], [0], [0], [1], [0, 0, 1, 1], [], []>} : vector<16x32xf32>, vector<32x32xf32>, vector<16x32xf32> -> vector<16x32xf32>
    %17 = vector.broadcast %2 : vector<1x32xf32> to vector<16x32xf32>
    %18 = arith.addf %16, %17 : vector<16x32xf32>
    %c0_17 = arith.constant 0 : index
    %c0_18 = arith.constant 0 : index
    %19 = vector.load %arg4[%c0_17, %c0_18] : memref<32x32xf32, #tpu.memory_space<vmem>>, vector<32x32xf32>
    %cst_19 = arith.constant dense<0.000000e+00> : vector<16x32xf32>
    %20 = tpu.matmul %0, %19, %cst_19 {dimension_numbers = #tpu.dot_dimension_numbers<[1], [0], [0], [1], [0, 0, 1, 1], [], []>} : vector<16x32xf32>, vector<32x32xf32>, vector<16x32xf32> -> vector<16x32xf32>
    %21 = vector.broadcast %3 : vector<1x32xf32> to vector<16x32xf32>
    %22 = arith.addf %20, %21 : vector<16x32xf32>
    %c0_20 = arith.constant 0 : index
    %c0_21 = arith.constant 0 : index
    %23 = vector.load %arg10[%c0_20, %c0_21] : memref<64x32xf32, #tpu.memory_space<vmem>>, vector<64x32xf32>
    %24 = tpu.concatenate %14, %14, %14, %14 in 0 : vector<16x32xf32>, vector<16x32xf32>, vector<16x32xf32>, vector<16x32xf32> -> vector<64x32xf32>
    %25 = arith.mulf %24, %23 : vector<64x32xf32>
    %cst_22 = arith.constant dense<0.000000e+00> : vector<64x16xf32>
    %26 = tpu.matmul %25, %18, %cst_22 {dimension_numbers = #tpu.dot_dimension_numbers<[1], [1], [0], [0], [0, 0, 1, 0], [], []>} : vector<64x32xf32>, vector<16x32xf32>, vector<64x16xf32> -> vector<64x16xf32>
    %cst_23 = arith.constant 0.353553385 : f32
    %27 = vector.broadcast %cst_23 : f32 to vector<64x16xf32>
    %28 = arith.mulf %26, %27 : vector<64x16xf32>
    %c0_24 = arith.constant 0 : index
    %c0_25 = arith.constant 0 : index
    %29 = vector.load %arg9[%c0_24, %c0_25] : memref<64x16xf32, #tpu.memory_space<vmem>>, vector<64x16xf32>
    %30 = arith.addf %28, %29 : vector<64x16xf32>
    %cst_26 = arith.constant dense<0xFF800000> : vector<64xf32>
    %31 = vector.multi_reduction <maximumf>, %30, %cst_26 [1] : vector<64x16xf32> to vector<64xf32>
    %32 = vector.shape_cast %31 : vector<64xf32> to vector<64x1xf32>
    %33 = vector.broadcast %32 : vector<64x1xf32> to vector<64x16xf32>
    %34 = arith.subf %30, %33 : vector<64x16xf32>
    %35 = math.exp %34 : vector<64x16xf32>
    %cst_27 = arith.constant dense<0.000000e+00> : vector<64xf32>
    %36 = vector.multi_reduction <add>, %35, %cst_27 [1] : vector<64x16xf32> to vector<64xf32>
    %37 = vector.shape_cast %36 : vector<64xf32> to vector<64x1xf32>
    %38 = tpu.reciprocal %37 {approx = true} : vector<64x1xf32> -> vector<64x1xf32>
    %39 = vector.broadcast %38 : vector<64x1xf32> to vector<64x16xf32>
    %40 = arith.mulf %35, %39 : vector<64x16xf32>
    %cst_28 = arith.constant dense<0.000000e+00> : vector<64x32xf32>
    %41 = tpu.matmul %40, %22, %cst_28 {dimension_numbers = #tpu.dot_dimension_numbers<[1], [0], [0], [1], [0, 0, 1, 1], [], []>} : vector<64x16xf32>, vector<16x32xf32>, vector<64x32xf32> -> vector<64x32xf32>
    %42 = arith.mulf %41, %23 : vector<64x32xf32>
    %43 = vector.extract_strided_slice %42 {offsets = [0, 0], sizes = [16, 32], strides = [1, 1]} : vector<64x32xf32> to vector<16x32xf32>
    %44 = vector.extract_strided_slice %42 {offsets = [16, 0], sizes = [16, 32], strides = [1, 1]} : vector<64x32xf32> to vector<16x32xf32>
    %45 = arith.addf %43, %44 : vector<16x32xf32>
    %46 = vector.extract_strided_slice %42 {offsets = [32, 0], sizes = [16, 32], strides = [1, 1]} : vector<64x32xf32> to vector<16x32xf32>
    %47 = arith.addf %45, %46 : vector<16x32xf32>
    %48 = vector.extract_strided_slice %42 {offsets = [48, 0], sizes = [16, 32], strides = [1, 1]} : vector<64x32xf32> to vector<16x32xf32>
    %49 = arith.addf %47, %48 : vector<16x32xf32>
    %c0_29 = arith.constant 0 : index
    %c0_30 = arith.constant 0 : index
    %50 = vector.load %arg5[%c0_29, %c0_30] : memref<32x32xf32, #tpu.memory_space<vmem>>, vector<32x32xf32>
    %cst_31 = arith.constant dense<0.000000e+00> : vector<16x32xf32>
    %51 = tpu.matmul %49, %50, %cst_31 {dimension_numbers = #tpu.dot_dimension_numbers<[1], [0], [0], [1], [0, 0, 1, 1], [], []>} : vector<16x32xf32>, vector<32x32xf32>, vector<16x32xf32> -> vector<16x32xf32>
    %52 = vector.broadcast %4 : vector<1x32xf32> to vector<16x32xf32>
    %53 = arith.addf %51, %52 : vector<16x32xf32>
    %54 = arith.addf %0, %53 : vector<16x32xf32>
    %cst_32 = arith.constant dense<0.000000e+00> : vector<16xf32>
    %55 = vector.multi_reduction <add>, %54, %cst_32 [1] : vector<16x32xf32> to vector<16xf32>
    %56 = vector.shape_cast %55 : vector<16xf32> to vector<16x1xf32>
    %cst_33 = arith.constant 3.200000e+01 : f32
    %57 = vector.broadcast %cst_33 : f32 to vector<16x1xf32>
    %58 = arith.divf %56, %57 : vector<16x1xf32>
    %59 = vector.broadcast %58 : vector<16x1xf32> to vector<16x32xf32>
    %60 = arith.subf %54, %59 : vector<16x32xf32>
    %61 = arith.mulf %60, %60 : vector<16x32xf32>
    %cst_34 = arith.constant dense<0.000000e+00> : vector<16xf32>
    %62 = vector.multi_reduction <add>, %61, %cst_34 [1] : vector<16x32xf32> to vector<16xf32>
    %63 = vector.shape_cast %62 : vector<16xf32> to vector<16x1xf32>
    %cst_35 = arith.constant 3.200000e+01 : f32
    %64 = vector.broadcast %cst_35 : f32 to vector<16x1xf32>
    %65 = arith.divf %63, %64 : vector<16x1xf32>
    %66 = vector.broadcast %58 : vector<16x1xf32> to vector<16x32xf32>
    %67 = arith.subf %54, %66 : vector<16x32xf32>
    %cst_36 = arith.constant 9.99999974E-6 : f32
    %68 = vector.broadcast %cst_36 : f32 to vector<16x1xf32>
    %69 = arith.addf %65, %68 : vector<16x1xf32>
    %70 = math.rsqrt %69 : vector<16x1xf32>
    %71 = vector.broadcast %70 : vector<16x1xf32> to vector<16x32xf32>
    %72 = arith.mulf %67, %71 : vector<16x32xf32>
    %73 = vector.broadcast %7 : vector<1x32xf32> to vector<16x32xf32>
    %74 = arith.mulf %72, %73 : vector<16x32xf32>
    %75 = vector.broadcast %8 : vector<1x32xf32> to vector<16x32xf32>
    %76 = arith.addf %74, %75 : vector<16x32xf32>
    %c0_37 = arith.constant 0 : index
    %c0_38 = arith.constant 0 : index
    %77 = vector.load %arg6[%c0_37, %c0_38] : memref<32x64xf32, #tpu.memory_space<vmem>>, vector<32x64xf32>
    %cst_39 = arith.constant dense<0.000000e+00> : vector<16x64xf32>
    %78 = tpu.matmul %76, %77, %cst_39 {dimension_numbers = #tpu.dot_dimension_numbers<[1], [0], [0], [1], [0, 0, 1, 1], [], []>} : vector<16x32xf32>, vector<32x64xf32>, vector<16x64xf32> -> vector<16x64xf32>
    %79 = vector.broadcast %5 : vector<1x64xf32> to vector<16x64xf32>
    %80 = arith.addf %78, %79 : vector<16x64xf32>
    %cst_40 = arith.constant 5.000000e-01 : f32
    %81 = vector.broadcast %cst_40 : f32 to vector<16x64xf32>
    %82 = arith.mulf %81, %80 : vector<16x64xf32>
    %cst_41 = arith.constant 0.707106769 : f32
    %83 = vector.broadcast %cst_41 : f32 to vector<16x64xf32>
    %84 = arith.mulf %80, %83 : vector<16x64xf32>
    %85 = math.erf %84 : vector<16x64xf32>
    %cst_42 = arith.constant 1.000000e+00 : f32
    %86 = vector.broadcast %cst_42 : f32 to vector<16x64xf32>
    %87 = arith.addf %86, %85 : vector<16x64xf32>
    %88 = arith.mulf %82, %87 : vector<16x64xf32>
    %c0_43 = arith.constant 0 : index
    %c0_44 = arith.constant 0 : index
    %89 = vector.load %arg7[%c0_43, %c0_44] : memref<64x32xf32, #tpu.memory_space<vmem>>, vector<64x32xf32>
    %cst_45 = arith.constant dense<0.000000e+00> : vector<16x32xf32>
    %90 = tpu.matmul %88, %89, %cst_45 {dimension_numbers = #tpu.dot_dimension_numbers<[1], [0], [0], [1], [0, 0, 1, 1], [], []>} : vector<16x64xf32>, vector<64x32xf32>, vector<16x32xf32> -> vector<16x32xf32>
    %91 = vector.broadcast %6 : vector<1x32xf32> to vector<16x32xf32>
    %92 = arith.addf %90, %91 : vector<16x32xf32>
    %93 = arith.addf %76, %92 : vector<16x32xf32>
    %cst_46 = arith.constant dense<0.000000e+00> : vector<16xf32>
    %94 = vector.multi_reduction <add>, %93, %cst_46 [1] : vector<16x32xf32> to vector<16xf32>
    %95 = vector.shape_cast %94 : vector<16xf32> to vector<16x1xf32>
    %cst_47 = arith.constant 3.200000e+01 : f32
    %96 = vector.broadcast %cst_47 : f32 to vector<16x1xf32>
    %97 = arith.divf %95, %96 : vector<16x1xf32>
    %98 = vector.broadcast %97 : vector<16x1xf32> to vector<16x32xf32>
    %99 = arith.subf %93, %98 : vector<16x32xf32>
    %100 = arith.mulf %99, %99 : vector<16x32xf32>
    %cst_48 = arith.constant dense<0.000000e+00> : vector<16xf32>
    %101 = vector.multi_reduction <add>, %100, %cst_48 [1] : vector<16x32xf32> to vector<16xf32>
    %102 = vector.shape_cast %101 : vector<16xf32> to vector<16x1xf32>
    %cst_49 = arith.constant 3.200000e+01 : f32
    %103 = vector.broadcast %cst_49 : f32 to vector<16x1xf32>
    %104 = arith.divf %102, %103 : vector<16x1xf32>
    %105 = vector.broadcast %97 : vector<16x1xf32> to vector<16x32xf32>
    %106 = arith.subf %93, %105 : vector<16x32xf32>
    %cst_50 = arith.constant 9.99999974E-6 : f32
    %107 = vector.broadcast %cst_50 : f32 to vector<16x1xf32>
    %108 = arith.addf %104, %107 : vector<16x1xf32>
    %109 = math.rsqrt %108 : vector<16x1xf32>
    %110 = vector.broadcast %109 : vector<16x1xf32> to vector<16x32xf32>
    %111 = arith.mulf %106, %110 : vector<16x32xf32>
    %112 = vector.broadcast %9 : vector<1x32xf32> to vector<16x32xf32>
    %113 = arith.mulf %111, %112 : vector<16x32xf32>
    %114 = vector.broadcast %10 : vector<1x32xf32> to vector<16x32xf32>
    %115 = arith.addf %113, %114 : vector<16x32xf32>
    %c0_51 = arith.constant 0 : index
    %c0_52 = arith.constant 0 : index
    %116 = vector.load %arg11[%c0_51, %c0_52] : memref<16x32xf32, #tpu.memory_space<vmem>>, vector<16x32xf32>
    tpu.vector_store %arg11[%c0_51, %c0_52], %115 {strides = array<i32>} : memref<16x32xf32, #tpu.memory_space<vmem>>, vector<16x32xf32>,
    return
  }
  func.func @transform_0(%arg0: i32) -> (i32, i32) {
    %c0_i32 = arith.constant 0 : i32
    %c0_i32_0 = arith.constant 0 : i32
    %c0_i32_1 = arith.constant 0 : i32
    return %c0_i32, %c0_i32_0 : i32, i32
  }
  func.func @transform_1(%arg0: i32) -> (i32, i32) {
    %c0_i32 = arith.constant 0 : i32
    %c0_i32_0 = arith.constant 0 : i32
    %c0_i32_1 = arith.constant 0 : i32
    return %c0_i32, %c0_i32_0 : i32, i32
  }
  func.func @transform_2(%arg0: i32) -> (i32, i32) {
    %c0_i32 = arith.constant 0 : i32
    %c0_i32_0 = arith.constant 0 : i32
    %c0_i32_1 = arith.constant 0 : i32
    return %c0_i32, %c0_i32_0 : i32, i32
  }
  func.func @transform_3(%arg0: i32) -> (i32, i32) {
    %c0_i32 = arith.constant 0 : i32
    %c0_i32_0 = arith.constant 0 : i32
    %c0_i32_1 = arith.constant 0 : i32
    return %c0_i32, %c0_i32_0 : i32, i32
  }
  func.func @transform_4(%arg0: i32) -> (i32, i32) {
    %c0_i32 = arith.constant 0 : i32
    %c0_i32_0 = arith.constant 0 : i32
    %c0_i32_1 = arith.constant 0 : i32
    return %c0_i32, %c0_i32_0 : i32, i32
  }
  func.func @transform_5(%arg0: i32) -> (i32, i32) {
    %c0_i32 = arith.constant 0 : i32
    %c0_i32_0 = arith.constant 0 : i32
    %c0_i32_1 = arith.constant 0 : i32
    return %c0_i32, %c0_i32_0 : i32, i32
  }
  func.func @transform_6(%arg0: i32) -> (i32, i32) {
    %c0_i32 = arith.constant 0 : i32
    %c0_i32_0 = arith.constant 0 : i32
    %c0_i32_1 = arith.constant 0 : i32
    return %c0_i32, %c0_i32_0 : i32, i32
  }
  func.func @transform_7(%arg0: i32) -> (i32, i32) {
    %c0_i32 = arith.constant 0 : i32
    %c0_i32_0 = arith.constant 0 : i32
    %c0_i32_1 = arith.constant 0 : i32
    return %c0_i32, %c0_i32_0 : i32, i32
  }
  func.func @transform_8(%arg0: i32) -> (i32, i32) {
    %c0_i32 = arith.constant 0 : i32
    %c0_i32_0 = arith.constant 0 : i32
    %c0_i32_1 = arith.constant 0 : i32
    return %c0_i32, %c0_i32_0 : i32, i32
  }
  func.func @transform_9(%arg0: i32) -> (i32, i32) {
    %c0_i32 = arith.constant 0 : i32
    %c0_i32_0 = arith.constant 0 : i32
    %c0_i32_1 = arith.constant 0 : i32
    return %c0_i32, %c0_i32_0 : i32, i32
  }
  func.func @transform_10(%arg0: i32) -> (i32, i32) {
    %c0_i32 = arith.constant 0 : i32
    %c0_i32_0 = arith.constant 0 : i32
    %c0_i32_1 = arith.constant 0 : i32
    return %c0_i32, %c0_i32_0 : i32, i32
  }
}

</mosaic_0001>

<bundles_post_ra>
// kernel: transformer_encoder_layer.1
= control target key start
LH: loop header
LB: loop body
LE: loop exit
PB: predicated region body
PF: predicated region fallthrough
CT: control target
= control target key end

     0   :  { %vm56_vm0 = vcmask 261120   ;;  %s1696_s0 = inlined_call_operand.vmem [shape: f32[16,32], index: 0, kind: input, shape index: {}]   ;;  %s1697_s1 = inlined_call_operand.vmem [shape: f32[32,32], index: 1, kind: input, shape index: {}]   ;;  %s1698_s2 = inlined_call_operand.vmem [shape: f32[32,32], index: 2, kind: input, shape index: {}]   ;;  %s1699_s3 = inlined_call_operand.vmem [shape: f32[32,32], index: 3, kind: input, shape index: {}]   ;;  %s1700_s4 = inlined_call_operand.vmem [shape: f32[32,32], index: 4, kind: input, shape index: {}]   ;;  %s1701_s5 = inlined_call_operand.vmem [shape: f32[32,64], index: 5, kind: input, shape index: {}]   ;;  %s1702_s6 = inlined_call_operand.vmem [shape: f32[64,32], index: 6, kind: input, shape index: {}]   ;;  %s1703_s7 = inlined_call_operand.vmem [shape: f32[10,64], index: 7, kind: input, shape index: {}]   ;;  %s1704_s8 = inlined_call_operand.vmem [shape: f32[64,16], index: 8, kind: input, shape index: {}]   ;;  %s1705_s9 = inlined_call_operand.vmem [shape: f32[64,32], index: 9, kind: input, shape index: {}]   ;;  %s1706_s10 = inlined_call_operand.hbm [shape: f32[16,32], index: 10, kind: output, shape index: {}]  }
   0x1   :  { %v51_v0 = vld [vmem:[%s1697_s1 + $0x18] sm:$0xff]  ;;  %v50_v1 = vld [vmem:[%s1697_s1 + $0x10] sm:$0xff]  ;;  %v1434_v2 = vld [vmem:[%s1696_s0] sm:$0xff] }
   0x2   :  { %1192 = vmatprep.subr.mxu0 %v51_v0  ;;  %v49_v3 = vld [vmem:[%s1697_s1 + $0x8] sm:$0xff]  ;;  %1200 = vmatprep.mubr.msk.f32.mxu0 %vm56_vm0, %v1434_v2 }
   0x3   :  { %1193 = vmatpush3.msra.mxu0 %v51_v0 }
   0x4   :  { %1194 = vmatprep.subr.mxu0 %v50_v1 }
   0x5   :  { %15 = vsyncpa [#allocation3], 0  ;;  %1195 = vmatpush3.msra.mxu0 %v50_v1  ;;  %v48_v4 = vld [vmem:[%s1697_s1] sm:$0xff]  ;;  %v1447_v5 = vld [vmem:[%s1696_s0 + $0x8] sm:$0xff]  ;;  %vm479_vm1 = vcmask 130048   ;;  %vm952_vm2 = vcmask 523264  }
   0x6   :  { %1196 = vmatprep.subr.mxu0 %v49_v3  ;;  %v141_v6 = vld [vmem:[%s1698_s2 + $0x18] sm:$0xff]  ;;  %v140_v7 = vld [vmem:[%s1698_s2 + $0x10] sm:$0xff]  ;;  %v139_v8 = vld [vmem:[%s1698_s2 + $0x8] sm:$0xff]  ;;  %s1367_s21 = smov [#allocation2]  }
   0x7   :  { %1197 = vmatpush3.msra.mxu0 %v49_v3  ;;  %v138_v9 = vld [vmem:[%s1698_s2] sm:$0xff]  ;;  %v1488_v22 = vld [vmem:[%s1705_s9 + $0x8] sm:$0xff]  ;;  %v1493_v23 = vld [vmem:[%s1705_s9 + $0x10] sm:$0xff]  ;;  %s1081_s22 = sshll.u32 %s1367_s21, 4  ;;  %s1082_s22 = int_to_ptr.vmem [resolvable:$true] %s1081_s22 }
   0x8   :  { %1198 = vmatprep.subr.mxu0 %v48_v4  ;;  %v1092_v11 = vld [vmem:[%s1703_s7] ss:$0 sm:$0xff]  ;;  %v1095_v16 = vld [vmem:[%s1703_s7 + $0x1] ss:$0 sm:$0xff]  ;;  %v1501_v26 = vld [vmem:[%s1705_s9 + $0x18] sm:$0xff]  ;;  %s1345_s23 = scalar_lea.vmem %s1082_s22, 256  ;;  %p1350_p1 = scmp.lt.s32.totalorder %s1082_s22, %s1082_s22 }
   0x9   :  { %1199 = vmatpush3.msra.mxu0 %v48_v4  ;;  %v1475_v13 = vld [vmem:[%s1705_s9] sm:$0xff]  ;;  %v1515_v30 = vld [vmem:[%s1705_s9 + $0x28] sm:$0xff]  ;;  %v1521_v31 = vld [vmem:[%s1705_s9 + $0x30] sm:$0xff]  ;;  %p1346_p0 = scmp.ne.s32.totalorder %s1082_s22, %s1345_s23  ;;  %p1351_p2 = scmp.lt.s32.totalorder %s1345_s23, %s1345_s23 }
   0xa   :  { %1201 = vmatmul.mubr.msk.f32.vlgmr.msra.gmra.mxu0 %vm56_vm0, %v1447_v5  ;;  %1203 = vmatprep.subr.mxu0 %v141_v6  ;;  %v1507_v27 = vld [vmem:[%s1705_s9 + $0x20] sm:$0xff]  ;;  %v1529_v34 = vld [vmem:[%s1705_s9 + $0x38] sm:$0xff]  ;;  %v223_v37 = vld [vmem:[%s1699_s3 + $0x10] sm:$0xff] }
   0xb   :  { %1204 = vmatpush3.msra.mxu0 %v141_v6  ;;  %1211 = vmatprep.mubr.msk.f32.mxu0 %vm56_vm0, %v1434_v2  ;;  %v224_v36 = vld [vmem:[%s1699_s3 + $0x18] sm:$0xff]  ;;  %v222_v38 = vld [vmem:[%s1699_s3 + $0x8] sm:$0xff]  ;;  %v221_v39 = vld [vmem:[%s1699_s3] sm:$0xff]  ;;  %p1352_p3 = por %p1351_p2, %p1350_p1 }
   0xc   :  { %1205 = vmatprep.subr.mxu0 %v140_v7  ;;  %v463_v42 = vld [vmem:[%s1704_s8] sm:$0xff]  ;;  %v464_v46 = vld [vmem:[%s1704_s8 + $0x8] sm:$0xff]  ;;  %v465_v50 = vld [vmem:[%s1704_s8 + $0x10] sm:$0xff] }
   0xd   :  { %1206 = vmatpush3.msra.mxu0 %v140_v7  ;;  %v466_v54 = vld [vmem:[%s1704_s8 + $0x18] sm:$0xff]  ;;  %v467_v59 = vld [vmem:[%s1704_s8 + $0x20] sm:$0xff]  ;;  %v468_v1 = vld [vmem:[%s1704_s8 + $0x28] sm:$0xff]  ;;  %p1353_p4 = pnand %p1352_p3, %p1346_p0 }
   0xe   :  { %1207 = vmatprep.subr.mxu0 %v139_v8  ;;  %v469_v7 = vld [vmem:[%s1704_s8 + $0x30] sm:$0xff] }
   0xf   :  { %1208 = vmatpush3.msra.mxu0 %v139_v8 }
  0x10   :  { %1209 = vmatprep.subr.mxu0 %v138_v9 }
  0x11   :  { %1210 = vmatpush3.msra.mxu0 %v138_v9 }
  0x12   :  { %1212 = vmatmul.mubr.msk.f32.vlgmr.msra.gmra.mxu0 %vm56_vm0, %v1447_v5  ;;  %1214 = vmatprep.subr.mxu0 %v224_v36 }
  0x13   :  { %1222 = vmatprep.mubr.msk.f32.mxu0 %vm56_vm0, %v1434_v2  ;;  %1215 = vmatpush3.msra.mxu0 %v224_v36 }
  0x14   :  { %1216 = vmatprep.subr.mxu0 %v223_v37 }
  0x15   :  { %1217 = vmatpush3.msra.mxu0 %v223_v37 }
  0x16   :  { %1218 = vmatprep.subr.mxu0 %v222_v38 }
  0x17   :  { %1219 = vmatpush3.msra.mxu0 %v222_v38 }
  0x18   :  { %1220 = vmatprep.subr.mxu0 %v221_v39 }
  0x19   :  { %1221 = vmatpush3.msra.mxu0 %v221_v39 }
  0x1a   :  { %1223 = vmatmul.mubr.msk.f32.vlgmr.msra.gmra.mxu0 %vm56_vm0, %v1447_v5 }
  0xca   :  { %v1202_v10 = vpop.f32.mrf.mxu0 }
  0xcb   :  { %v135_v21 = vadd.f32 %v1202_v10, %v1092_v11 }
  0xcc   :  { %v129_v12 = vpop.f32.mrf.mxu0 }
  0xcd   :  { %v130_v14 = vadd.f32 %v1092_v11, %v129_v12  ;;  %v313_v24 = vmul.f32 %v1488_v22, %v135_v21  ;;  %v315_v28 = vmul.f32 %v1501_v26, %v135_v21  ;;  %v317_v32 = vmul.f32 %v1515_v30, %v135_v21  ;;  %v470_v12 = vld [vmem:[%s1704_s8 + $0x38] sm:$0xff] }
  0xce   :  { %v319_v35 = vmul.f32 %v1529_v34, %v135_v21 }
  0xcf   :  { %v312_v15 = vmul.f32 %v1475_v13, %v130_v14  ;;  %v314_v25 = vmul.f32 %v1493_v23, %v130_v14  ;;  %v316_v29 = vmul.f32 %v1507_v27, %v130_v14  ;;  %v318_v33 = vmul.f32 %v1521_v31, %v130_v14 }
  0xd1   :  { %1229 = vmatprep.mubr.msk.f32.mxu1 %vm56_vm0, %v312_v15 }
  0xd2   :  { %v1213_v17 = vpop.f32.mrf.mxu0 }
  0xd3   :  { %v218_v18 = vadd.f32 %v1213_v17, %v1095_v16 }
  0xd4   :  { %v212_v19 = vpop.f32.mrf.mxu0 }
  0xd5   :  { %v213_v20 = vadd.f32 %v1095_v16, %v212_v19  ;;  %1225 = vmatprep.subr.msk.mxu1 %vm56_vm0, %v218_v18 }
  0xd6   :  { %1226 = vmatpush3.xpose.msk.msra.mxu1 %vm56_vm0, %v218_v18 }
  0xd7   :  { %1227 = vmatprep.subr.msk.mxu1 %vm56_vm0, %v213_v20 }
  0xda   :  { %1228 = vmatpush3.xpose.msk.msra.mxu1 %vm56_vm0, %v213_v20 }
  0xdd   :  { %1230 = vmatmul.mubr.msk.f32.vlgmr.msra.gmra.mxu1 %vm56_vm0, %v313_v24 }
  0xde   :  { %1232 = vmatprep.mubr.msk.f32.mxu1 %vm56_vm0, %v314_v25 }
  0xe1   :  { %1233 = vmatmul.mubr.msk.f32.gmra.mxu1 %vm56_vm0, %v315_v28 }
  0xe2   :  { %1235 = vmatprep.mubr.msk.f32.mxu1 %vm56_vm0, %v316_v29 }
  0xe5   :  { %1236 = vmatmul.mubr.msk.f32.gmra.mxu1 %vm56_vm0, %v317_v32 }
  0xe6   :  { %1238 = vmatprep.mubr.msk.f32.mxu1 %vm56_vm0, %v318_v33 }
  0xe9   :  { %1239 = vmatmul.mubr.msk.f32.gmra.mxu1 %vm56_vm0, %v319_v35 }
 0x19d   :  { %v1231_v40 = vpop.f32.mrf.mxu1 }
 0x19e   :  { %v456_v43 = vmul.f32 0.35355338, %v1231_v40 }
 0x19f   :  { %v416_v41 = vpop.f32.mrf.mxu1 }
 0x1a0   :  { %v455_v44 = vmul.f32 0.35355338, %v416_v41  ;;  %v472_v53 = vadd.f32 %v464_v46, %v456_v43 }
 0x1a1   :  { %v1234_v45 = vpop.f32.mrf.mxu1 }
 0x1a2   :  { %v471_v47 = vadd.f32 %v463_v42, %v455_v44  ;;  %v458_v48 = vmul.f32 0.35355338, %v1234_v45  ;;  %v483_v62 = vsel %vm479_vm1, %v472_v53, -inf }
 0x1a3   :  { %v426_v49 = vpop.f32.mrf.mxu1 }
 0x1a4   :  { %v457_v51 = vmul.f32 0.35355338, %v426_v49  ;;  %v480_v52 = vsel %vm479_vm1, %v471_v47, -inf  ;;  %v474_v58 = vadd.f32 %v466_v54, %v458_v48 }
 0x1a5   :  { %481 = vmax.xlane.f32.xlu0 %v480_v52  ;;  %v1237_v55 = vpop.f32.mrf.mxu1 }
 0x1a6   :  { %v473_v56 = vadd.f32 %v465_v50, %v457_v51  ;;  %v460_v60 = vmul.f32 0.35355338, %v1237_v55  ;;  %v489_v6 = vsel %vm479_vm1, %v474_v58, -inf }
 0x1a7   :  { %v436_v57 = vpop.f32.mrf.mxu1 }
 0x1a8   :  { %v459_v61 = vmul.f32 0.35355338, %v436_v57  ;;  %v486_v63 = vsel %vm479_vm1, %v473_v56, -inf  ;;  %v476_v11 = vadd.f32 %v468_v1, %v460_v60 }
 0x1a9   :  { %484 = vmax.xlane.f32.xlu0 %v483_v62  ;;  %487 = vmax.xlane.f32.xlu1 %v486_v63  ;;  %v1240_v0 = vpop.f32.mrf.mxu1 }
 0x1aa   :  { %v475_v3 = vadd.f32 %v467_v59, %v459_v61  ;;  %v462_v8 = vmul.f32 0.35355338, %v1240_v0  ;;  %v495_v15 = vsel %vm479_vm1, %v476_v11, -inf }
 0x1ab   :  { %v446_v4 = vpop.f32.mrf.mxu1 }
 0x1ac   :  { %v461_v9 = vmul.f32 0.35355338, %v446_v4  ;;  %v492_v10 = vsel %vm479_vm1, %v475_v3, -inf  ;;  %v478_v17 = vadd.f32 %v470_v12, %v462_v8  ;;  %v1098_v4 = vld [vmem:[%s1703_s7 + $0x2] ss:$0 sm:$0xff] }
 0x1ad   :  { %490 = vmax.xlane.f32.xlu1 %v489_v6  ;;  %493 = vmax.xlane.f32.xlu0 %v492_v10 }
 0x1ae   :  { %v477_v14 = vadd.f32 %v469_v7, %v461_v9  ;;  %v501_v18 = vsel %vm479_vm1, %v478_v17, -inf }
 0x1b0   :  { %v498_v16 = vsel %vm479_vm1, %v477_v14, -inf }
 0x1b1   :  { %496 = vmax.xlane.f32.xlu1 %v495_v15  ;;  %499 = vmax.xlane.f32.xlu0 %v498_v16 }
 0x1b5   :  { %502 = vmax.xlane.f32.xlu1 %v501_v18 }
 0x22e   :  { %v482_v19 = vpop.xlane.xlu0 %481 }
 0x22f   :  { %v504_v20 = vsub.f32 %v471_v47, %v482_v19 }
 0x231   :  { %v512_v21 = vmul.f32 1.442695, %v504_v20 }
 0x232   :  { %v485_v24 = vpop.xlane.xlu0 %484  ;;  %v488_v25 = vpop.xlane.xlu1 %487 }
 0x233   :  { %1301 = vpow2.f32 %v512_v21  ;;  %v505_v28 = vsub.f32 %v472_v53, %v485_v24  ;;  %v506_v29 = vsub.f32 %v473_v56, %v488_v25 }
 0x235   :  { %v514_v32 = vmul.f32 1.442695, %v505_v28  ;;  %v516_v33 = vmul.f32 1.442695, %v506_v29 }
 0x236   :  { %v491_v35 = vpop.xlane.xlu1 %490  ;;  %v494_v36 = vpop.xlane.xlu0 %493 }
 0x237   :  { %1303 = vpow2.f32 %v514_v32  ;;  %v507_v37 = vsub.f32 %v474_v58, %v491_v35  ;;  %v508_v38 = vsub.f32 %v475_v3, %v494_v36  ;;  %v1224_v3 = vpop.f32.mrf.mxu0 }
 0x238   :  { %1305 = vpow2.f32 %v516_v33  ;;  %v301_v6 = vadd.f32 %v1224_v3, %v1098_v4 }
 0x239   :  { %v518_v39 = vmul.f32 1.442695, %v507_v37  ;;  %v520_v40 = vmul.f32 1.442695, %v508_v38  ;;  %v295_v7 = vpop.f32.mrf.mxu0 }
 0x23a   :  { %v497_v41 = vpop.xlane.xlu1 %496  ;;  %v500_v42 = vpop.xlane.xlu0 %499  ;;  %v296_v8 = vadd.f32 %v1098_v4, %v295_v7  ;;  %1241 = vmatprep.subr.mxu0 %v301_v6 }
 0x23b   :  { %1307 = vpow2.f32 %v518_v39  ;;  %v509_v43 = vsub.f32 %v476_v11, %v497_v41  ;;  %v510_v44 = vsub.f32 %v477_v14, %v500_v42  ;;  %1242 = vmatpush3.msra.mxu0 %v301_v6  ;;  %v714_v41 = vld [vmem:[%s1700_s4 + $0x18] sm:$0xff]  ;;  %v713_v42 = vld [vmem:[%s1700_s4 + $0x10] sm:$0xff] }
 0x23c   :  { %1309 = vpow2.f32 %v520_v40  ;;  %1243 = vmatprep.subr.mxu0 %v296_v8  ;;  %1257 = vmatprep.subr.mxu1 %v714_v41 }
 0x23d   :  { %v522_v45 = vmul.f32 1.442695, %v509_v43  ;;  %v524_v46 = vmul.f32 1.442695, %v510_v44  ;;  %1244 = vmatpush3.msra.mxu0 %v296_v8  ;;  %1258 = vmatpush3.msra.mxu1 %v714_v41  ;;  %v712_v43 = vld [vmem:[%s1700_s4 + $0x8] sm:$0xff]  ;;  %v711_v44 = vld [vmem:[%s1700_s4] sm:$0xff] }
 0x23e   :  { %v503_v47 = vpop.xlane.xlu1 %502  ;;  %1259 = vmatprep.subr.mxu1 %v713_v42 }
 0x23f   :  { %1311 = vpow2.f32 %v522_v45  ;;  %v511_v48 = vsub.f32 %v478_v17, %v503_v47  ;;  %1260 = vmatpush3.msra.mxu1 %v713_v42  ;;  %v947_v42 = vld [vmem:[%s1702_s6 + $0x38] sm:$0xff] }
 0x240   :  { %v1302_v49 = vpop.eup %1301  ;;  %1313 = vpow2.f32 %v524_v46  ;;  %1261 = vmatprep.subr.mxu1 %v712_v43 }
 0x241   :  { %v526_v50 = vmul.f32 1.442695, %v511_v48  ;;  %v528_v51 = vsel %vm479_vm1, %v1302_v49, 0.0  ;;  %1262 = vmatpush3.msra.mxu1 %v712_v43  ;;  %v946_v43 = vld [vmem:[%s1702_s6 + $0x30] sm:$0xff] }
 0x242   :  { %529 = vadd.xlane.f32.xlu0 %v528_v51  ;;  %1263 = vmatprep.subr.mxu1 %v711_v44 }
 0x243   :  { %1315 = vpow2.f32 %v526_v50  ;;  %1264 = vmatpush3.msra.mxu1 %v711_v44  ;;  %v945_v44 = vld [vmem:[%s1702_s6 + $0x28] sm:$0xff] }
 0x244   :  { %v1304_v52 = vpop.eup %1303  ;;  %1279 = vmatprep.subr.mxu1 %v947_v42 }
 0x245   :  { %v1306_v53 = vpop.eup %1305  ;;  %v531_v54 = vsel %vm479_vm1, %v1304_v52, 0.0 }
 0x246   :  { %532 = vadd.xlane.f32.xlu1 %v531_v54  ;;  %v534_v55 = vsel %vm479_vm1, %v1306_v53, 0.0 }
 0x247   :  { %535 = vadd.xlane.f32.xlu0 %v534_v55 }
 0x248   :  { %v1308_v56 = vpop.eup %1307 }
 0x249   :  { %v1310_v57 = vpop.eup %1309  ;;  %v537_v58 = vsel %vm479_vm1, %v1308_v56, 0.0 }
 0x24a   :  { %538 = vadd.xlane.f32.xlu1 %v537_v58  ;;  %v540_v59 = vsel %vm479_vm1, %v1310_v57, 0.0 }
 0x24b   :  { %541 = vadd.xlane.f32.xlu0 %v540_v59 }
 0x24c   :  { %v1312_v60 = vpop.eup %1311 }
 0x24d   :  { %v1314_v61 = vpop.eup %1313  ;;  %v543_v62 = vsel %vm479_vm1, %v1312_v60, 0.0 }
 0x24e   :  { %544 = vadd.xlane.f32.xlu1 %v543_v62  ;;  %v546_v63 = vsel %vm479_vm1, %v1314_v61, 0.0 }
 0x24f   :  { %547 = vadd.xlane.f32.xlu0 %v546_v63 }
 0x250   :  { %v1316_v0 = vpop.eup %1315 }
 0x251   :  { %v549_v1 = vsel %vm479_vm1, %v1316_v0, 0.0 }
 0x252   :  { %550 = vadd.xlane.f32.xlu1 %v549_v1 }
 0x2cb   :  { %v530_v9 = vpop.xlane.xlu0 %529 }
 0x2cc   :  { %1317 = vrcp.f32 %v530_v9 }
 0x2cf   :  { %v533_v10 = vpop.xlane.xlu1 %532 }
 0x2d0   :  { %1319 = vrcp.f32 %v533_v10  ;;  %v536_v11 = vpop.xlane.xlu0 %535 }
 0x2d1   :  { %1321 = vrcp.f32 %v536_v11 }
 0x2d3   :  { %v539_v12 = vpop.xlane.xlu1 %538 }
 0x2d4   :  { %1323 = vrcp.f32 %v539_v12  ;;  %v542_v14 = vpop.xlane.xlu0 %541 }
 0x2d5   :  { %1325 = vrcp.f32 %v542_v14 }
 0x2d7   :  { %v545_v15 = vpop.xlane.xlu1 %544 }
 0x2d8   :  { %1327 = vrcp.f32 %v545_v15  ;;  %v548_v16 = vpop.xlane.xlu0 %547 }
 0x2d9   :  { %v1318_v17 = vpop.eup %1317  ;;  %1329 = vrcp.f32 %v548_v16  ;;  %v843_v16 = vld [vmem:[%s1701_s5 + $0x10] sm:$0xff] }
 0x2da   :  { %v560_v18 = vmul.f32 %v1318_v17, %v1302_v49  ;;  %v842_v17 = vld [vmem:[%s1701_s5 + $0x8] sm:$0xff] }
 0x2db   :  { %v551_v19 = vpop.xlane.xlu1 %550 }
 0x2dc   :  { %1331 = vrcp.f32 %v551_v19  ;;  %1245 = vmatprep.mubr.msk.f32.mxu0 %vm479_vm1, %v560_v18  ;;  %v841_v18 = vld [vmem:[%s1701_s5] sm:$0xff] }
 0x2dd   :  { %v1320_v20 = vpop.eup %1319 }
 0x2de   :  { %v1322_v21 = vpop.eup %1321  ;;  %v561_v24 = vmul.f32 %v1320_v20, %v1304_v52 }
 0x2df   :  { %v562_v25 = vmul.f32 %v1322_v21, %v1306_v53 }
 0x2e0   :  { %1246 = vmatmul.mubr.msk.f32.vlgmr.msra.gmra.mxu0 %vm479_vm1, %v561_v24 }
 0x2e1   :  { %v1324_v28 = vpop.eup %1323  ;;  %1248 = vmatprep.mubr.msk.f32.mxu0 %vm479_vm1, %v562_v25 }
 0x2e2   :  { %v1326_v29 = vpop.eup %1325  ;;  %v563_v32 = vmul.f32 %v1324_v28, %v1308_v56 }
 0x2e3   :  { %v564_v33 = vmul.f32 %v1326_v29, %v1310_v57 }
 0x2e4   :  { %1249 = vmatmul.mubr.msk.f32.gmra.mxu0 %vm479_vm1, %v563_v32  ;;  %v1122_v32 = vld [vmem:[%s1703_s7 + $0x6] ss:$0 sm:$0xff] }
 0x2e5   :  { %v1328_v35 = vpop.eup %1327  ;;  %1251 = vmatprep.mubr.msk.f32.mxu0 %vm479_vm1, %v564_v33 }
 0x2e6   :  { %v1330_v36 = vpop.eup %1329  ;;  %v565_v37 = vmul.f32 %v1328_v35, %v1312_v60 }
 0x2e7   :  { %v566_v38 = vmul.f32 %v1330_v36, %v1314_v61 }
 0x2e8   :  { %1252 = vmatmul.mubr.msk.f32.gmra.mxu0 %vm479_vm1, %v565_v37 }
 0x2e9   :  { %v1332_v39 = vpop.eup %1331  ;;  %1254 = vmatprep.mubr.msk.f32.mxu0 %vm479_vm1, %v566_v38  ;;  %v1123_v38 = vld [vmem:[%s1703_s7 + $0x7] ss:$0 sm:$0xff] }
 0x2ea   :  { %v567_v40 = vmul.f32 %v1332_v39, %v1316_v0 }
 0x2ec   :  { %1255 = vmatmul.mubr.msk.f32.gmra.mxu0 %vm479_vm1, %v567_v40 }
 0x3a0   :  { %v1247_v45 = vpop.f32.mrf.mxu0 }
 0x3a1   :  { %v698_v55 = vmul.f32 %v1247_v45, %v1488_v22  ;;  %v944_v45 = vld [vmem:[%s1702_s6 + $0x20] sm:$0xff] }
 0x3a2   :  { %v658_v46 = vpop.f32.mrf.mxu0 }
 0x3a3   :  { %v697_v53 = vmul.f32 %v658_v46, %v1475_v13  ;;  %v1119_v13 = vld [vmem:[%s1703_s7 + $0x3] ss:$0 sm:$0xff]  ;;  %v943_v46 = vld [vmem:[%s1702_s6 + $0x18] sm:$0xff] }
 0x3a4   :  { %v1250_v47 = vpop.f32.mrf.mxu0 }
 0x3a5   :  { %v700_v51 = vmul.f32 %v1250_v47, %v1501_v26  ;;  %v942_v47 = vld [vmem:[%s1702_s6 + $0x10] sm:$0xff] }
 0x3a6   :  { %v668_v48 = vpop.f32.mrf.mxu0 }
 0x3a7   :  { %v699_v50 = vmul.f32 %v668_v48, %v1493_v23  ;;  %v706_v59 = vadd.f32 %v700_v51, %v698_v55  ;;  %v941_v48 = vld [vmem:[%s1702_s6 + $0x8] sm:$0xff] }
 0x3a8   :  { %v1253_v49 = vpop.f32.mrf.mxu0 }
 0x3a9   :  { %v702_v56 = vmul.f32 %v1253_v49, %v1515_v30  ;;  %v705_v58 = vadd.f32 %v699_v50, %v697_v53  ;;  %v940_v49 = vld [vmem:[%s1702_s6] sm:$0xff] }
 0x3aa   :  { %v678_v52 = vpop.f32.mrf.mxu0  ;;  %v1124_v50 = vld [vmem:[%s1703_s7 + $0x4] ss:$0 sm:$0xff] }
 0x3ab   :  { %v701_v54 = vmul.f32 %v678_v52, %v1507_v27  ;;  %v708_v63 = vadd.f32 %v706_v59, %v702_v56 }
 0x3ac   :  { %v1256_v57 = vpop.f32.mrf.mxu0 }
 0x3ad   :  { %v704_v60 = vmul.f32 %v1256_v57, %v1529_v34  ;;  %v707_v62 = vadd.f32 %v705_v58, %v701_v54 }
 0x3ae   :  { %v688_v61 = vpop.f32.mrf.mxu0 }
 0x3af   :  { %v703_v23 = vmul.f32 %v688_v61, %v1521_v31  ;;  %v710_v0 = vadd.f32 %v708_v63, %v704_v60 }
 0x3b1   :  { %v709_v26 = vadd.f32 %v707_v62, %v703_v23 }
 0x3b3   :  { %1265 = vmatprep.mubr.msk.f32.mxu1 %vm56_vm0, %v709_v26  ;;  %v1127_v26 = vld [vmem:[%s1703_s7 + $0x5] ss:$0 sm:$0xff] }
 0x3b4   :  { %1266 = vmatmul.mubr.msk.f32.vlgmr.msra.gmra.mxu1 %vm56_vm0, %v710_v0 }
 0x3b5   :  { %1280 = vmatpush3.msra.mxu1 %v947_v42 }
 0x3b6   :  { %1281 = vmatprep.subr.mxu1 %v946_v43 }
 0x3b7   :  { %1282 = vmatpush3.msra.mxu1 %v946_v43 }
 0x3b8   :  { %1283 = vmatprep.subr.mxu1 %v945_v44 }
 0x3b9   :  { %1284 = vmatpush3.msra.mxu1 %v945_v44 }
 0x3ba   :  { %1285 = vmatprep.subr.mxu1 %v944_v45 }
 0x3bb   :  { %1286 = vmatpush3.msra.mxu1 %v944_v45 }
 0x3bc   :  { %1287 = vmatprep.subr.mxu1 %v943_v46 }
 0x3bd   :  { %1288 = vmatpush3.msra.mxu1 %v943_v46 }
 0x3be   :  { %1289 = vmatprep.subr.mxu1 %v942_v47 }
 0x3bf   :  { %1290 = vmatpush3.msra.mxu1 %v942_v47 }
 0x3c0   :  { %1291 = vmatprep.subr.mxu1 %v941_v48 }
 0x3c1   :  { %1292 = vmatpush3.msra.mxu1 %v941_v48 }
 0x3c2   :  { %1293 = vmatprep.subr.mxu1 %v940_v49 }
 0x3c3   :  { %1294 = vmatpush3.msra.mxu1 %v940_v49 }
 0x474   :  { %v1267_v22 = vpop.f32.mrf.mxu1 }
 0x475   :  { %v797_v27 = vadd.f32 %v1267_v22, %v1119_v13 }
 0x476   :  { %v791_v30 = vpop.f32.mrf.mxu1 }
 0x477   :  { %v792_v1 = vadd.f32 %v1119_v13, %v791_v30  ;;  %v801_v34 = vadd.f32 %v797_v27, %v1447_v5 }
 0x479   :  { %v805_v3 = vsel %vm56_vm0, %v801_v34, 0.0  ;;  %v800_v31 = vadd.f32 %v792_v1, %v1434_v2  ;;  %v844_v2 = vld [vmem:[%s1701_s5 + $0x18] sm:$0xff] }
 0x47a   :  { %806 = vadd.xlane.f32.xlu1 %v805_v3  ;;  %1268 = vmatprep.subr.mxu0 %v844_v2 }
 0x47b   :  { %v802_v4 = vsel %vm56_vm0, %v800_v31, 0.0  ;;  %1269 = vmatpush3.msra.mxu0 %v844_v2 }
 0x47c   :  { %803 = vadd.xlane.f32.xlu0 %v802_v4  ;;  %1270 = vmatprep.subr.mxu0 %v843_v16 }
 0x47d   :  { %1271 = vmatpush3.msra.mxu0 %v843_v16 }
 0x47e   :  { %1272 = vmatprep.subr.mxu0 %v842_v17 }
 0x47f   :  { %1273 = vmatpush3.msra.mxu0 %v842_v17 }
 0x480   :  { %1274 = vmatprep.subr.mxu0 %v841_v18 }
 0x481   :  { %1275 = vmatpush3.msra.mxu0 %v841_v18 }
 0x503   :  { %v807_v6 = vpop.xlane.xlu1 %806 }
 0x504   :  { %v810_v7 = vmul.f32 0.03125, %v807_v6 }
 0x505   :  { %v804_v8 = vpop.xlane.xlu0 %803 }
 0x506   :  { %v812_v9 = vsub.f32 %v801_v34, %v810_v7  ;;  %v809_v10 = vmul.f32 0.03125, %v804_v8 }
 0x508   :  { %v811_v11 = vsub.f32 %v800_v31, %v809_v10  ;;  %v814_v12 = vmul.f32 %v812_v9, %v812_v9 }
 0x50a   :  { %v818_v14 = vsel %vm56_vm0, %v814_v12, 0.0  ;;  %v813_v15 = vmul.f32 %v811_v11, %v811_v11 }
 0x50b   :  { %819 = vadd.xlane.f32.xlu1 %v818_v14 }
 0x50c   :  { %v815_v5 = vsel %vm56_vm0, %v813_v15, 0.0 }
 0x50d   :  { %816 = vadd.xlane.f32.xlu0 %v815_v5 }
 0x594   :  { %v820_v19 = vpop.xlane.xlu1 %819 }
 0x595   :  { %v822_v20 = vmul.f32 0.03125, %v820_v19 }
 0x596   :  { %v817_v21 = vpop.xlane.xlu0 %816 }
 0x597   :  { %v824_v24 = vadd.f32 1e-05, %v822_v20  ;;  %v821_v25 = vmul.f32 0.03125, %v817_v21  ;;  %v1130_v20 = vld [vmem:[%s1703_s7 + $0x8] ss:$0 sm:$0xff] }
 0x599   :  { %1333 = vrsqrt.f32 %v824_v24  ;;  %v823_v28 = vadd.f32 1e-05, %v821_v25  ;;  %v1131_v25 = vld [vmem:[%s1703_s7 + $0x9] ss:$0 sm:$0xff] }
 0x59b   :  { %1335 = vrsqrt.f32 %v823_v28 }
 0x5a6   :  { %v1334_v29 = vpop.eup %1333 }
 0x5a7   :  { %v828_v33 = vmul.f32 %v1334_v29, %v812_v9 }
 0x5a8   :  { %v1336_v35 = vpop.eup %1335 }
 0x5a9   :  { %v827_v36 = vmul.f32 %v1336_v35, %v811_v11  ;;  %v834_v37 = vmul.f32 %v1122_v32, %v828_v33 }
 0x5ab   :  { %v833_v39 = vmul.f32 %v1122_v32, %v827_v36  ;;  %v840_v41 = vadd.f32 %v1123_v38, %v834_v37 }
 0x5ad   :  { %v839_v40 = vadd.f32 %v1123_v38, %v833_v39 }
 0x5af   :  { %1276 = vmatprep.mubr.msk.f32.mxu0 %vm56_vm0, %v839_v40 }
 0x5b0   :  { %1277 = vmatmul.mubr.msk.f32.vlgmr.msra.gmra.mxu0 %vm56_vm0, %v840_v41 }
 0x670   :  { %v1278_v51 = vpop.f32.mrf.mxu0 }
 0x671   :  { %v927_v52 = vadd.f32 %v1278_v51, %v1124_v50 }
 0x672   :  { %v921_v53 = vpop.f32.mrf.mxu0 }
 0x673   :  { %v933_v54 = vmul.f32 0.70710677, %v927_v52  ;;  %v922_v55 = vadd.f32 %v1124_v50, %v921_v53  ;;  %v931_v62 = vmul.f32 0.5, %v927_v52 }
 0x675   :  { %1337 = verf.f32 %v933_v54  ;;  %v932_v56 = vmul.f32 0.70710677, %v922_v55  ;;  %v930_v60 = vmul.f32 0.5, %v922_v55 }
 0x677   :  { %1339 = verf.f32 %v932_v56 }
 0x682   :  { %v1338_v57 = vpop.eup %1337 }
 0x683   :  { %v937_v59 = vadd.f32 1.0, %v1338_v57 }
 0x684   :  { %v1340_v58 = vpop.eup %1339 }
 0x685   :  { %v936_v61 = vadd.f32 1.0, %v1340_v58  ;;  %v939_v63 = vmul.f32 %v937_v59, %v931_v62 }
 0x687   :  { %v938_v23 = vmul.f32 %v936_v61, %v930_v60 }
 0x689   :  { %1295 = vmatprep.mubr.msk.f32.mxu1 %vm952_vm2, %v938_v23 }
 0x68a   :  { %1296 = vmatmul.mubr.msk.f32.vlgmr.msra.gmra.mxu1 %vm952_vm2, %v939_v63 }
 0x74a   :  { %v1297_v0 = vpop.f32.mrf.mxu1 }
 0x74b   :  { %v1031_v13 = vadd.f32 %v1297_v0, %v1127_v26 }
 0x74c   :  { %v1025_v22 = vpop.f32.mrf.mxu1 }
 0x74d   :  { %v1026_v27 = vadd.f32 %v1127_v26, %v1025_v22  ;;  %v1035_v30 = vadd.f32 %v1031_v13, %v840_v41 }
 0x74f   :  { %v1039_v1 = vsel %vm56_vm0, %v1035_v30, 0.0  ;;  %v1034_v34 = vadd.f32 %v1026_v27, %v839_v40 }
 0x750   :  { %1040 = vadd.xlane.f32.xlu1 %v1039_v1 }
 0x751   :  { %v1036_v3 = vsel %vm56_vm0, %v1034_v34, 0.0 }
 0x752   :  { %1037 = vadd.xlane.f32.xlu0 %v1036_v3 }
 0x7d9   :  { %v1041_v31 = vpop.xlane.xlu1 %1040 }
 0x7da   :  { %v1043_v4 = vmul.f32 0.03125, %v1041_v31 }
 0x7db   :  { %v1038_v6 = vpop.xlane.xlu0 %1037 }
 0x7dc   :  { %v1045_v7 = vsub.f32 %v1035_v30, %v1043_v4  ;;  %v1042_v8 = vmul.f32 0.03125, %v1038_v6 }
 0x7de   :  { %v1044_v9 = vsub.f32 %v1034_v34, %v1042_v8  ;;  %v1047_v10 = vmul.f32 %v1045_v7, %v1045_v7 }
 0x7e0   :  { %v1051_v11 = vsel %vm56_vm0, %v1047_v10, 0.0  ;;  %v1046_v12 = vmul.f32 %v1044_v9, %v1044_v9 }
 0x7e1   :  { %1052 = vadd.xlane.f32.xlu1 %v1051_v11 }
 0x7e2   :  { %v1048_v14 = vsel %vm56_vm0, %v1046_v12, 0.0 }
 0x7e3   :  { %1049 = vadd.xlane.f32.xlu0 %v1048_v14 }
 0x86a   :  { %v1053_v15 = vpop.xlane.xlu1 %1052 }
 0x86b   :  { %v1055_v5 = vmul.f32 0.03125, %v1053_v15 }
 0x86c   :  { %v1050_v2 = vpop.xlane.xlu0 %1049 }
 0x86d   :  { %v1057_v16 = vadd.f32 1e-05, %v1055_v5  ;;  %v1054_v17 = vmul.f32 0.03125, %v1050_v2 }
 0x86f   :  { %1341 = vrsqrt.f32 %v1057_v16  ;;  %v1056_v18 = vadd.f32 1e-05, %v1054_v17 }
 0x871   :  { %1343 = vrsqrt.f32 %v1056_v18 }
 0x87c   :  { %v1342_v19 = vpop.eup %1341 }
 0x87d   :  { %v1061_v21 = vmul.f32 %v1342_v19, %v1045_v7 }
 0x87e   :  { %v1344_v24 = vpop.eup %1343 }
 0x87f   :  { %v1060_v28 = vmul.f32 %v1344_v24, %v1044_v9  ;;  %v1067_v29 = vmul.f32 %v1130_v20, %v1061_v21 }
 0x881   :  { %v1066_v32 = vmul.f32 %v1130_v20, %v1060_v28  ;;  %v1073_v33 = vadd.f32 %v1131_v25, %v1067_v29 }
 0x883   :  { %v1072_v35 = vadd.f32 %v1131_v25, %v1066_v32  ;;  %1075 = vst.msk [vmem:[#allocation2 + $0x8] sm:$0xff] %vm56_vm0, %v1073_v33 }
 0x885   :  { %1074 = vst.msk [vmem:[#allocation2] sm:$0xff] %vm56_vm0, %v1072_v35 }
 0x886   :  { %1356 = shalt.err (!%p1353_p4)
}
 0x887   :  { %s1368_s7 = smov 128   ;;  %s1369_s5 = smov 8  }
 0x888   :  { %1087 = dma.vmem_to_hbm [thread:$0]  %s1082_s22, 256, %s1706_s10, [#allocation3], %s1368_s7, %s1368_s7, %s1369_s5  }
 0x889   :  { %1365 = dma.done.wait [#allocation3], 256  }
 0x88a   :  { %1366 = vsyncadd [#allocation3], 4294967040 }
 0x88b   :  { %1091 = vsyncpa [#allocation3], 1 }

</bundles_post_ra>
